<compile_context>
chip_gen: v7x
topology: tpu7x:2x2x1
jax: 0.10.0
libtpu: 0.0.40
codegen_flags: <defaults>
</compile_context>

<pallas_src>
import functools

import jax
import jax.numpy as jnp
from jax.experimental import pallas as pl
from jax.experimental.pallas import tpu as pltpu

HEAD_PAD = 128            # lane width of the hidden layer and fused head slab
DEFAULT_BLOCK_ROWS = 128  # MXU-row-aligned obs rows per grid step


def _round_up(x, m):
    return ((x + m - 1) // m) * m


# ---------------------------------------------------------------------------
# Kernel: one grid step processes a [bm, in_space] slab of obs.
#   h   = LeakyReLU(obs @ W1pad + b1pad)          [bm, 128]
#   out = h @ W2Hpad + b2h                        [bm, 128]
# W2Hpad = pad(W2 @ [Wp|Wp2|Wv]) and b2h = b2 @ [Wp|Wp2|Wv] + [bp|bp2|bv]
# were folded at pack time; zero-padded lanes/rows contribute nothing.
# ---------------------------------------------------------------------------
def core_kernel(obs_ref, p_ref, out_ref, *, in_space, off_b1, off_w2h, off_b2h):
    x = obs_ref[...]                                  # [bm, in_space]
    w1 = p_ref[0:in_space, :]                         # [in_space, 128]
    b1 = p_ref[off_b1:off_b1 + 1, :]                  # [1, 128]
    h = jnp.dot(x, w1, preferred_element_type=jnp.float32) + b1
    h = jnp.maximum(h, 0.01 * h)                      # LeakyReLU(0.01); keeps 0-lanes at 0

    w2h = p_ref[off_w2h:off_w2h + HEAD_PAD, :]        # [128, 128]
    b2h = p_ref[off_b2h:off_b2h + 1, :]               # [1, 128]
    out_ref[...] = jnp.dot(h, w2h, preferred_element_type=jnp.float32) + b2h


def pack_params(params, in_space, h_space, a_space):
    """Fold layer 2 into the heads and pack everything into one [rows,128] f32 buffer."""
    n_head = 2 * a_space + 1
    assert h_space <= HEAD_PAD and n_head <= HEAD_PAD
    assert in_space % 8 == 0, "pad the obs feature dim to a multiple of 8"

    off_b1 = _round_up(in_space, 8)
    off_w2h = off_b1 + 8
    off_b2h = off_w2h + HEAD_PAD
    rows = off_b2h + 8

    # Fold the second Linear into the fused heads (forward-equivalent in f32).
    wheads = jnp.concatenate([params["wp"], params["wp2"], params["wv"]], axis=1)  # [h, n_head]
    bheads = jnp.concatenate([params["bp"], params["bp2"], params["bv"]], axis=1)  # [1, n_head]
    w2h = params["w2"] @ wheads                       # [h, n_head]
    b2h = params["b2"] @ wheads + bheads              # [1, n_head]

    p = jnp.zeros((rows, HEAD_PAD), jnp.float32)
    p = p.at[0:in_space, 0:h_space].set(params["w1"])
    p = p.at[off_b1, 0:h_space].set(params["b1"].reshape(h_space))
    p = p.at[off_w2h:off_w2h + h_space, 0:n_head].set(w2h)
    p = p.at[off_b2h, 0:n_head].set(b2h.reshape(n_head))
    offsets = dict(off_b1=off_b1, off_w2h=off_w2h, off_b2h=off_b2h)
    return p, offsets


def core_forward_fused(obs, packed, offsets, in_space, *, block_rows=DEFAULT_BLOCK_ROWS):
    """obs: [B, in_space] f32 -> fused [B, 128] slab (cols: [logits|logits2|v|0-pad])."""
    B = obs.shape[0]
    bm = min(block_rows, _round_up(B, 8))
    Bp = _round_up(B, bm)
    if Bp != B:
        obs = jnp.pad(obs, ((0, Bp - B), (0, 0)))
    n_blocks = Bp // bm

    kernel = functools.partial(core_kernel, in_space=in_space, **offsets)

    flops = 2 * Bp * (in_space * HEAD_PAD + HEAD_PAD * HEAD_PAD)
    bytes_accessed = 4 * (obs.size + packed.size + Bp * HEAD_PAD)

    fused = pl.pallas_call(
        kernel,
        out_shape=jax.ShapeDtypeStruct((Bp, HEAD_PAD), jnp.float32),
        grid=(n_blocks,),
        in_specs=[
            pl.BlockSpec((bm, in_space), lambda i: (i, 0)),
            # Same block index for every grid step -> params DMA'd once and
            # kept VMEM-resident across the whole grid.
            pl.BlockSpec((packed.shape[0], HEAD_PAD), lambda i: (0, 0)),
        ],
        out_specs=pl.BlockSpec((bm, HEAD_PAD), lambda i: (i, 0)),
        compiler_params=pltpu.CompilerParams(
            dimension_semantics=("parallel",)),  # shard grid over both TCs on v7x
        cost_estimate=pl.CostEstimate(flops=flops, transcendentals=0,
                                      bytes_accessed=bytes_accessed),
    )(obs, packed)
    return fused[:B]


def split_heads(fused, a_space):
    """Slice the fused slab as late as possible (only where the pieces are consumed)."""
    logits = fused[:, :a_space]
    logits2 = fused[:, a_space:2 * a_space]
    v = fused[:, 2 * a_space:2 * a_space + 1]
    return logits, logits2, v


def init_params(key, in_space, h_space, a_space):
    """Deterministic synthetic init (uniform, scaled by fan-in like PyTorch)."""
    ks = jax.random.split(key, 10)

    def lin(kw, kb, fan_in, fan_out):
        bound = 1.0 / jnp.sqrt(jnp.float32(fan_in))
        w = jax.random.uniform(kw, (fan_in, fan_out), jnp.float32, -bound, bound)
        b = jax.random.uniform(kb, (1, fan_out), jnp.float32, -bound, bound)
        return w, b

    w1, b1 = lin(ks[0], ks[1], in_space, h_space)
    w2, b2 = lin(ks[2], ks[3], h_space, h_space)
    wp, bp = lin(ks[4], ks[5], h_space, a_space)
    wp2, bp2 = lin(ks[6], ks[7], h_space, a_space)
    wv, bv = lin(ks[8], ks[9], h_space, 1)
    return dict(w1=w1, b1=b1, w2=w2, b2=b2,
                wp=wp, bp=bp, wp2=wp2, bp2=bp2, wv=wv, bv=bv)


if __name__ == "__main__":
    # Config-derived sizes: o_space=16, obs_capacity=2 -> in_space=32
    # (negotiation disabled), h_space=32, a_space=4.  Batch = 256 rollout rows
    # -> grid of 2 steps, 128 MXU rows each, params resident across the grid.
    o_space, obs_capacity, h_space, a_space = 16, 2, 32, 4
    in_space = o_space * obs_capacity
    B = 256

    key = jax.random.PRNGKey(0)
    k_obs, k_par = jax.random.split(key)
    obs = jax.random.normal(k_obs, (B, in_space), jnp.float32)
    params = init_params(k_par, in_space, h_space, a_space)

    # Pack (and fold layer 2 into the heads) once; amortized across rollout calls.
    packed, offsets = pack_params(params, in_space, h_space, a_space)

    fused = core_forward_fused(obs, packed, offsets, in_space)
    logits, logits2, v = split_heads(fused, a_space)
    jax.block_until_ready((logits, logits2, v))

    # Pure-JAX reference against the original (unfused, unfolded) formulation.
    h = obs @ params["w1"] + params["b1"]
    h = jnp.where(h > 0, h, 0.01 * h)
    h = h @ params["w2"] + params["b2"]
    ref_logits = h @ params["wp"] + params["bp"]
    ref_logits2 = h @ params["wp2"] + params["bp2"]
    ref_v = h @ params["wv"] + params["bv"]          # value(h.detach()): same forward value

    assert logits.shape == (B, a_space)
    assert logits2.shape == (B, a_space)
    assert v.shape == (B, 1)
    assert jnp.allclose(logits, ref_logits, atol=1e-5)
    assert jnp.allclose(logits2, ref_logits2, atol=1e-5)
    assert jnp.allclose(v, ref_v, atol=1e-5)

    print("KERNEL_OK")
</pallas_src>

<mosaic_0001>
module attributes {stable_mosaic.version = 11 : i64} {
  func.func @core_kernel(%arg0: i32, %arg1: memref<128x32xf32, #tpu.memory_space<vmem>>, %arg2: memref<176x128xf32, #tpu.memory_space<vmem>>, %arg3: memref<128x128xf32, #tpu.memory_space<vmem>>) attributes {dimension_semantics = [#tpu.dimension_semantics<parallel>], iteration_bounds = array<i64: 2>, scalar_prefetch = 0 : i64, scratch_operands = 0 : i64, tpu.core_type = #tpu.core_type<tc>, window_params = [{transform_indices = @transform_0, window_bounds = array<i64: 128, 32>}, {pipeline_mode = #tpu.pipeline_mode<synchronous>, transform_indices = @transform_1, window_bounds = array<i64: 176, 128>}, {transform_indices = @transform_2, window_bounds = array<i64: 128, 128>}]} {
    %c0 = arith.constant 0 : index
    %c0_0 = arith.constant 0 : index
    %0 = vector.load %arg1[%c0, %c0_0] : memref<128x32xf32, #tpu.memory_space<vmem>>, vector<128x32xf32>
    %c0_1 = arith.constant 0 : index
    %c0_2 = arith.constant 0 : index
    %1 = vector.load %arg2[%c0_1, %c0_2] : memref<176x128xf32, #tpu.memory_space<vmem>>, vector<32x128xf32>
    %c32 = arith.constant 32 : index
    %c0_3 = arith.constant 0 : index
    %2 = vector.load %arg2[%c32, %c0_3] : memref<176x128xf32, #tpu.memory_space<vmem>>, vector<1x128xf32>
    %cst = arith.constant dense<0.000000e+00> : vector<128x128xf32>
    %3 = tpu.matmul %0, %1, %cst {dimension_numbers = #tpu.dot_dimension_numbers<[1], [0], [0], [1], [0, 0, 1, 1], [], []>} : vector<128x32xf32>, vector<32x128xf32>, vector<128x128xf32> -> vector<128x128xf32>
    %4 = vector.broadcast %2 : vector<1x128xf32> to vector<128x128xf32>
    %5 = arith.addf %3, %4 : vector<128x128xf32>
    %cst_4 = arith.constant 0.00999999977 : f32
    %6 = vector.broadcast %cst_4 : f32 to vector<128x128xf32>
    %7 = arith.mulf %6, %5 : vector<128x128xf32>
    %8 = arith.maximumf %5, %7 : vector<128x128xf32>
    %c40 = arith.constant 40 : index
    %c0_5 = arith.constant 0 : index
    %9 = vector.load %arg2[%c40, %c0_5] : memref<176x128xf32, #tpu.memory_space<vmem>>, vector<128x128xf32>
    %c168 = arith.constant 168 : index
    %c0_6 = arith.constant 0 : index
    %10 = vector.load %arg2[%c168, %c0_6] : memref<176x128xf32, #tpu.memory_space<vmem>>, vector<1x128xf32>
    %cst_7 = arith.constant dense<0.000000e+00> : vector<128x128xf32>
    %11 = tpu.matmul %8, %9, %cst_7 {dimension_numbers = #tpu.dot_dimension_numbers<[1], [0], [0], [1], [0, 0, 1, 1], [], []>} : vector<128x128xf32>, vector<128x128xf32>, vector<128x128xf32> -> vector<128x128xf32>
    %12 = vector.broadcast %10 : vector<1x128xf32> to vector<128x128xf32>
    %13 = arith.addf %11, %12 : vector<128x128xf32>
    %c0_8 = arith.constant 0 : index
    %c0_9 = arith.constant 0 : index
    %14 = vector.load %arg3[%c0_8, %c0_9] : memref<128x128xf32, #tpu.memory_space<vmem>>, vector<128x128xf32>
    tpu.vector_store %arg3[%c0_8, %c0_9], %13 {strides = array<i32>} : memref<128x128xf32, #tpu.memory_space<vmem>>, vector<128x128xf32>,
    return
  }
  func.func @transform_0(%arg0: i32) -> (i32, i32) {
    %c0_i32 = arith.constant 0 : i32
    %c0_i32_0 = arith.constant 0 : i32
    return %arg0, %c0_i32 : i32, i32
  }
  func.func @transform_1(%arg0: i32) -> (i32, i32) {
    %c0_i32 = arith.constant 0 : i32
    %c0_i32_0 = arith.constant 0 : i32
    %c0_i32_1 = arith.constant 0 : i32
    return %c0_i32, %c0_i32_0 : i32, i32
  }
  func.func @transform_2(%arg0: i32) -> (i32, i32) {
    %c0_i32 = arith.constant 0 : i32
    %c0_i32_0 = arith.constant 0 : i32
    return %arg0, %c0_i32 : i32, i32
  }
}

</mosaic_0001>

<bundles_post_ra>
// kernel: tpu_custom_call.1
= control target key start
LH: loop header
LB: loop body
LE: loop exit
PB: predicated region body
PF: predicated region fallthrough
CT: control target
= control target key end

     0   :  { %7 = vsyncpa [#allocation3], 0  ;;  %s1247_s0 = inlined_call_operand.vmem [shape: f32[256,32], index: 0, kind: input, shape index: {}]   ;;  %s1248_s1 = inlined_call_operand.vmem [shape: f32[176,128], index: 1, kind: input, shape index: {}]   ;;  %s1249_s2 = inlined_call_operand.hbm [shape: f32[256,128], index: 2, kind: output, shape index: {}]  }
   0x1   :  { %9 = vsyncpa [#allocation3 + $0x1], 0  ;;  %s1004_s9 = smov 0   ;;  %s1006_s10 = smov 0  }
   0x2   :  { %s1008_s11 = smov 0   ;;  %s1010_s12 = smov 0  }
   0x3 LB: > { %s1025_s13 = sadd.s32 4294967295, %s984_s12   ;;  %s654_s14 = sadd.s32 4294967294, %s984_s12   ;;  %s984_s12 = sphi %s1010_s12, %s1255_s12   ;;  %s980_s11 = sphi %s1008_s11, %s1254_s11   ;;  %s976_s10 = sphi %s1006_s10, %s1253_s10   ;;  %s972_s9 = sphi %s1004_s9, %s1252_s9  }
   0x4   : > { %s1029_s15 = sadd.s32 1, %s984_s12   ;;  %s69_s16 = sadd.s32 1, %s980_s11 }
   0x5   : > { %s66_s17 = ssub.s32 %s984_s12, %s1029_s15  ;;  %p79_p0 = scmp.ne.s32.totalorder %s980_s11, %s976_s10 }
   0x6   : > { %p67_p1 = scmp.eq.s32.totalorder %s66_s17, 0  ;;  %p80_p2 = scmp.eq.s32.totalorder %s1025_s13, 1 }
   0x7   : > { %p85_p3 = scmp.ne.s32.totalorder %s976_s10, %s972_s9  ;;  %p86_p4 = scmp.eq.s32.totalorder %s654_s14, 1 }
   0x8   : > { %s1040_s18 = scalar_select %p67_p1, %s980_s11, %s69_s16  }
   0x9   : > { %p1042_p5 = por %p80_p2, %p79_p0  ;;  %p1046_p6 = por %p86_p4, %p85_p3 }
   0xa   : > { %p657_p7 = scmp.ge.s32.totalorder %s984_s12, 1  ;;  %p116_p8 = scmp.lt.s32.totalorder %s984_s12, 3 }
   0xc   : > { %p117_p9 = pnand %p657_p7, %p116_p8 }
   0xd   : > { %v161_v0 = vld [vmem:[%s1248_s1] sm:$0xff] (!%p117_p9)  ;;  %v162_v1 = vld [vmem:[%s1248_s1 + $0x8] sm:$0xff] (!%p117_p9)  ;;  %v163_v2 = vld [vmem:[%s1248_s1 + $0x10] sm:$0xff] (!%p117_p9)  ;;  %s659_s27 = sshll.u32 (!%p117_p9), %s1025_s13, 4  ;;  %vm170_vm0 = vcmask (!%p117_p9), 261120   ;;  %s135_s30 = sand.u32 (!%p117_p9), 1, %s976_s10  }
   0xe   : > { %120 = sbr.rel (%p117_p9) target bundleno = 504 (0x1f8), region = 28  ;;  %v825_v3 = vpack.c.bf16 (!%p117_p9), %v162_v1, %v161_v0  ;;  %v164_v4 = vld [vmem:[%s1248_s1 + $0x18] sm:$0xff] (!%p117_p9)  ;;  %p139_p10 = scmp.lt.s32.totalorder (!%p117_p9), %s659_s27, 31  ;;  %v396_v5 = vld [vmem:[%s1248_s1 + $0x28] sm:$0xff] (!%p117_p9)  ;;  %v397_v6 = vld [vmem:[%s1248_s1 + $0x30] sm:$0xff] (!%p117_p9) }
   0xf   : > { %v829_v7 = vpack.c.bf16 (!%p117_p9), %v164_v4, %v163_v2  ;;  %v833_v8 = vpack.c.bf16 (!%p117_p9), %v397_v6, %v396_v5  ;;  %v398_v9 = vld [vmem:[%s1248_s1 + $0x38] sm:$0xff] (!%p117_p9)  ;;  %v399_v10 = vld [vmem:[%s1248_s1 + $0x40] sm:$0xff] (!%p117_p9)  ;;  %v400_v12 = vld [vmem:[%s1248_s1 + $0x48] sm:$0xff] (!%p117_p9)  ;;  %s658_s3 = sshll.u32 (!%p117_p9), %s135_s30, 7  ;;  %s684_s7 = sshll.u32 (!%p117_p9), %s1025_s13, 11 }
  0x10   : > { %826 = vmatprep.subr.bf16.mxu0 (!%p117_p9), %v825_v3  ;;  %v837_v11 = vpack.c.bf16 (!%p117_p9), %v399_v10, %v398_v9  ;;  %v401_v13 = vld [vmem:[%s1248_s1 + $0x50] sm:$0xff] (!%p117_p9)  ;;  %v402_v18 = vld [vmem:[%s1248_s1 + $0x58] sm:$0xff] (!%p117_p9)  ;;  %v403_v19 = vld [vmem:[%s1248_s1 + $0x60] sm:$0xff] (!%p117_p9)  ;;  %s1177_s6 = scalar_lea.vmem (!%p117_p9), [#allocation2], %s658_s3  ;;  %s1198_s17 = scalar_lea.hbm (!%p117_p9), %s1249_s2, %s684_s7 }
  0x11   : > { %828 = vmatpush3.bf16.msra.mxu0 (!%p117_p9), %v825_v3  ;;  %865 = vmatprep.subr.bf16.mxu1 (!%p117_p9), %v833_v8  ;;  %v841_v16 = vpack.c.bf16 (!%p117_p9), %v401_v13, %v400_v12  ;;  %v845_v21 = vpack.c.bf16 (!%p117_p9), %v403_v19, %v402_v18  ;;  %v404_v23 = vld [vmem:[%s1248_s1 + $0x68] sm:$0xff] (!%p117_p9)  ;;  %v405_v24 = vld [vmem:[%s1248_s1 + $0x70] sm:$0xff] (!%p117_p9)  ;;  %v406_v28 = vld [vmem:[%s1248_s1 + $0x78] sm:$0xff] (!%p117_p9)  ;;  %s592_s8 = sshll.u32 (!%p117_p9), %s1177_s6, 4  ;;  %s1206_s13 = scalar_lea.sflag (!%p117_p9), [#allocation3], %s135_s30  ;;  %s1200_s8 = int_to_ptr.vmem [resolvable:$true] %s592_s8 }
  0x12   : > { %830 = vmatprep.subr.bf16.mxu0 (!%p117_p9), %v829_v7  ;;  %873 = vmatpush3.bf16.msra.mxu1 (!%p117_p9), %v833_v8  ;;  %v849_v26 = vpack.c.bf16 (!%p117_p9), %v405_v24, %v404_v23  ;;  %v407_v29 = vld [vmem:[%s1248_s1 + $0x80] sm:$0xff] (!%p117_p9)  ;;  %v408_v40 = vld [vmem:[%s1248_s1 + $0x88] sm:$0xff] (!%p117_p9)  ;;  %v409_v41 = vld [vmem:[%s1248_s1 + $0x90] sm:$0xff] (!%p117_p9)  ;;  %s922_s21 = scalar_lea.vmem (!%p117_p9), %s1200_s8, 2048  ;;  %s986_s22 = smov (!%p117_p9), [#allocation2]  }
  0x13   : > { %866 = vmatprep.subr.bf16.mxu1 (!%p117_p9), %v837_v11  ;;  %v853_v31 = vpack.c.bf16 (!%p117_p9), %v407_v29, %v406_v28  ;;  %v857_v42 = vpack.c.bf16 (!%p117_p9), %v409_v41, %v408_v40  ;;  %v410_v43 = vld [vmem:[%s1248_s1 + $0x98] sm:$0xff] (!%p117_p9)  ;;  %v411_v44 = vld [vmem:[%s1248_s1 + $0xa0] sm:$0xff] (!%p117_p9)  ;;  %p923_p11 = scmp.ne.s32.totalorder (!%p117_p9), %s1200_s8, %s922_s21  ;;  %s926_s23 = sshll.u32 (!%p117_p9), %s986_s22, 4  ;;  %s927_s23 = int_to_ptr.vmem [resolvable:$false] %s926_s23 }
  0x14   : > { %v861_v45 = vpack.c.bf16 (!%p117_p9), %v411_v44, %v410_v43  ;;  %v1153_v46 = vld [vmem:[%s1248_s1 + $0x20] ss:$0 sm:$0xff] (!%p117_p9)  ;;  %s928_s24 = scalar_lea.vmem (!%p117_p9), %s927_s23, 4096  ;;  %p929_p0 = scmp.lt.s32.totalorder (!%p117_p9), %s1200_s8, %s927_s23 }
  0x15   : > { %s1257_s27 = smov (!%p139_p10, %s659_s27), 31  ;;  %832 = vmatpush3.bf16.msra.mxu0 %v829_v7  ;;  %p924_p12 = pnand %p923_p11, %p1042_p5 }
  0x16   : > { %s660_s16 = sshll.u32 %s1257_s27, 3  ;;  %834 = vmatprep.subr.bf16.mxu0 %v833_v8  ;;  %874 = vmatpush3.bf16.msra.mxu1 %v837_v11  ;;  %p930_p1 = scmp.lt.s32.totalorder %s928_s24, %s922_s21 }
  0x17   : > { %s1086_s26 = scalar_lea.vmem %s1247_s0, %s660_s16  ;;  %867 = vmatprep.subr.bf16.mxu1 %v841_v16  ;;  %p925_p13 = pneg %p924_p12 }
  0x18   : > { %v145_v14 = vld [vmem:[%s1086_s26] sm:$0xff]  ;;  %v146_v15 = vld [vmem:[%s1086_s26 + $0x8] sm:$0xff]  ;;  %v147_v17 = vld [vmem:[%s1086_s26 + $0x10] sm:$0xff]  ;;  %p931_p2 = por %p930_p1, %p929_p0 }
  0x19   : > { %745 = vmatprep.mubr.msk.f32.mxu0 %vm170_vm0, %v145_v14  ;;  %v148_v20 = vld [vmem:[%s1086_s26 + $0x18] sm:$0xff]  ;;  %v149_v22 = vld [vmem:[%s1086_s26 + $0x20] sm:$0xff]  ;;  %v150_v25 = vld [vmem:[%s1086_s26 + $0x28] sm:$0xff] }
  0x1a   : > { %746 = vmatmul.mubr.msk.f32.vlgmr.msra.gmra.mrb[0].mxu0 %vm170_vm0, %v146_v15  ;;  %875 = vmatpush3.bf16.msra.mxu1 %v841_v16  ;;  %v151_v27 = vld [vmem:[%s1086_s26 + $0x30] sm:$0xff]  ;;  %v152_v30 = vld [vmem:[%s1086_s26 + $0x38] sm:$0xff]  ;;  %v153_v32 = vld [vmem:[%s1086_s26 + $0x40] sm:$0xff]  ;;  %p932_p3 = pnand %p931_p2, %p925_p13 }
  0x1b   : > { %748 = vmatprep.mubr.msk.f32.mxu0 %vm170_vm0, %v147_v17  ;;  %836 = vmatpush3.bf16.msra.mxu0 %v833_v8  ;;  %v154_v33 = vld [vmem:[%s1086_s26 + $0x48] sm:$0xff]  ;;  %v155_v34 = vld [vmem:[%s1086_s26 + $0x50] sm:$0xff]  ;;  %v156_v35 = vld [vmem:[%s1086_s26 + $0x58] sm:$0xff] }
  0x1c   : > { %838 = vmatprep.subr.bf16.mxu0 %v837_v11  ;;  %868 = vmatprep.subr.bf16.mxu1 %v845_v21  ;;  %v157_v36 = vld [vmem:[%s1086_s26 + $0x60] sm:$0xff]  ;;  %v158_v37 = vld [vmem:[%s1086_s26 + $0x68] sm:$0xff]  ;;  %v159_v38 = vld [vmem:[%s1086_s26 + $0x70] sm:$0xff] }
  0x1d   : > { %v160_v39 = vld [vmem:[%s1086_s26 + $0x78] sm:$0xff] }
  0x1e   : > { %749 = vmatmul.mubr.msk.f32.gmra.mrb[2].mxu0 %vm170_vm0, %v148_v20  ;;  %876 = vmatpush3.bf16.msra.mxu1 %v845_v21 }
  0x1f   : > { %751 = vmatprep.mubr.msk.f32.mxu0 %vm170_vm0, %v149_v22  ;;  %840 = vmatpush3.bf16.msra.mxu0 %v837_v11 }
  0x20   : > { %842 = vmatprep.subr.bf16.mxu0 %v841_v16  ;;  %869 = vmatprep.subr.bf16.mxu1 %v849_v26 }
  0x22   : > { %752 = vmatmul.mubr.msk.f32.gmra.mrb[4].mxu0 %vm170_vm0, %v150_v25  ;;  %877 = vmatpush3.bf16.msra.mxu1 %v849_v26 }
  0x23   : > { %754 = vmatprep.mubr.msk.f32.mxu0 %vm170_vm0, %v151_v27  ;;  %844 = vmatpush3.bf16.msra.mxu0 %v841_v16 }
  0x24   : > { %846 = vmatprep.subr.bf16.mxu0 %v845_v21  ;;  %870 = vmatprep.subr.bf16.mxu1 %v853_v31 }
  0x26   : > { %755 = vmatmul.mubr.msk.f32.gmra.mrb[6].mxu0 %vm170_vm0, %v152_v30  ;;  %878 = vmatpush3.bf16.msra.mxu1 %v853_v31 }
  0x27   : > { %757 = vmatprep.mubr.msk.f32.mxu0 %vm170_vm0, %v153_v32  ;;  %848 = vmatpush3.bf16.msra.mxu0 %v845_v21 }
  0x28   : > { %850 = vmatprep.subr.bf16.mxu0 %v849_v26  ;;  %871 = vmatprep.subr.bf16.mxu1 %v857_v42 }
  0x2a   : > { %758 = vmatmul.mubr.msk.f32.gmra.mrb[8].mxu0 %vm170_vm0, %v154_v33  ;;  %879 = vmatpush3.bf16.msra.mxu1 %v857_v42 }
  0x2b   : > { %760 = vmatprep.mubr.msk.f32.mxu0 %vm170_vm0, %v155_v34  ;;  %852 = vmatpush3.bf16.msra.mxu0 %v849_v26 }
  0x2c   : > { %854 = vmatprep.subr.bf16.mxu0 %v853_v31  ;;  %872 = vmatprep.subr.bf16.mxu1 %v861_v45 }
  0x2e   : > { %761 = vmatmul.mubr.msk.f32.gmra.mrb[10].mxu0 %vm170_vm0, %v156_v35  ;;  %880 = vmatpush3.bf16.msra.mxu1 %v861_v45 }
  0x2f   : > { %763 = vmatprep.mubr.msk.f32.mxu0 %vm170_vm0, %v157_v36  ;;  %856 = vmatpush3.bf16.msra.mxu0 %v853_v31 }
  0x30   : > { %858 = vmatprep.subr.bf16.mxu0 %v857_v42 }
  0x32   : > { %764 = vmatmul.mubr.msk.f32.gmra.mrb[12].mxu0 %vm170_vm0, %v158_v37 }
  0x33   : > { %766 = vmatprep.mubr.msk.f32.mxu0 %vm170_vm0, %v159_v38  ;;  %860 = vmatpush3.bf16.msra.mxu0 %v857_v42 }
  0x34   : > { %862 = vmatprep.subr.bf16.mxu0 %v861_v45 }
  0x36   : > { %767 = vmatmul.mubr.msk.f32.gmra.mrb[14].mxu0 %vm170_vm0, %v160_v39 }
  0x37   : > { %864 = vmatpush3.bf16.msra.mxu0 %v861_v45 }
  0xed   : > { %v747_v47 = vpop.f32.mrb[0].mxu0 }
  0xee   : > { %v291_v48 = vadd.f32 %v747_v47, %v1153_v46  ;;  %v285_v49 = vpop.f32.mrb[1].mxu0 }
  0xef   : > { %v286_v50 = vadd.f32 %v1153_v46, %v285_v49 }
  0xf0   : > { %v365_v51 = vmul.f32 0.01, %v291_v48 }
  0xf1   : > { %v364_v52 = vmul.f32 0.01, %v286_v50  ;;  %v750_v53 = vpop.f32.mrb[2].mxu0 }
  0xf2   : > { %v301_v54 = vadd.f32 %v750_v53, %v1153_v46  ;;  %v295_v55 = vpop.f32.mrb[3].mxu0  ;;  %v381_v58 = vmax.f32 %v291_v48, %v365_v51  ;;  %v678_v48 = vld [vmem:[%s1248_s1 + $0xa8] ss:$0 sm:$0xff] }
  0xf3   : > { %v380_v56 = vmax.f32 %v286_v50, %v364_v52  ;;  %v296_v57 = vadd.f32 %v1153_v46, %v295_v55 }
  0xf4   : > { %v367_v59 = vmul.f32 0.01, %v301_v54 }
  0xf5   : > { %v366_v60 = vmul.f32 0.01, %v296_v57  ;;  %v753_v61 = vpop.f32.mrb[4].mxu0  ;;  %801 = vmatprep.mubr.f32.mxu0 %v380_v56 }
  0xf6   : > { %v311_v62 = vadd.f32 %v753_v61, %v1153_v46  ;;  %v305_v63 = vpop.f32.mrb[5].mxu0  ;;  %802 = vmatmul.mubr.f32.vlgmr.msra.gmra.mrb[16].mxu0 %v381_v58  ;;  %v383_v2 = vmax.f32 %v301_v54, %v367_v59 }
  0xf7   : > { %v382_v0 = vmax.f32 %v296_v57, %v366_v60  ;;  %v306_v1 = vadd.f32 %v1153_v46, %v305_v63 }
  0xf8   : > { %v369_v3 = vmul.f32 0.01, %v311_v62 }
  0xf9   : > { %v368_v4 = vmul.f32 0.01, %v306_v1  ;;  %v756_v5 = vpop.f32.mrb[6].mxu0  ;;  %804 = vmatprep.mubr.f32.mxu0 %v382_v0 }
  0xfa   : > { %v321_v6 = vadd.f32 %v756_v5, %v1153_v46  ;;  %v315_v7 = vpop.f32.mrb[7].mxu0  ;;  %805 = vmatmul.mubr.f32.gmra.mrb[18].mxu0 %v383_v2  ;;  %v385_v10 = vmax.f32 %v311_v62, %v369_v3 }
  0xfb   : > { %v384_v8 = vmax.f32 %v306_v1, %v368_v4  ;;  %v316_v9 = vadd.f32 %v1153_v46, %v315_v7 }
  0xfc   : > { %v371_v11 = vmul.f32 0.01, %v321_v6 }
  0xfd   : > { %v759_v12 = vpop.f32.mrb[8].mxu0  ;;  %807 = vmatprep.mubr.f32.mxu0 %v384_v8  ;;  %v370_v13 = vmul.f32 0.01, %v316_v9 }
  0xfe   : > { %v331_v14 = vadd.f32 %v759_v12, %v1153_v46  ;;  %v325_v15 = vpop.f32.mrb[9].mxu0  ;;  %808 = vmatmul.mubr.f32.gmra.mrb[20].mxu0 %v385_v10  ;;  %v387_v18 = vmax.f32 %v321_v6, %v371_v11 }
  0xff   : > { %v326_v16 = vadd.f32 %v1153_v46, %v325_v15  ;;  %v386_v17 = vmax.f32 %v316_v9, %v370_v13 }
 0x100   : > { %v373_v19 = vmul.f32 0.01, %v331_v14 }
 0x101   : > { %v372_v20 = vmul.f32 0.01, %v326_v16  ;;  %v762_v21 = vpop.f32.mrb[10].mxu0  ;;  %810 = vmatprep.mubr.f32.mxu1 %v386_v17 }
 0x102   : > { %v341_v22 = vadd.f32 %v762_v21, %v1153_v46  ;;  %v335_v23 = vpop.f32.mrb[11].mxu0  ;;  %811 = vmatmul.mubr.f32.vlgmr.msra.gmra.mrb[0].mxu1 %v387_v18  ;;  %v389_v26 = vmax.f32 %v331_v14, %v373_v19 }
 0x103   : > { %v388_v24 = vmax.f32 %v326_v16, %v372_v20  ;;  %v336_v25 = vadd.f32 %v1153_v46, %v335_v23 }
 0x104   : > { %v375_v27 = vmul.f32 0.01, %v341_v22 }
 0x105   : > { %v374_v28 = vmul.f32 0.01, %v336_v25  ;;  %v765_v29 = vpop.f32.mrb[12].mxu0  ;;  %813 = vmatprep.mubr.f32.mxu1 %v388_v24 }
 0x106   : > { %v351_v30 = vadd.f32 %v765_v29, %v1153_v46  ;;  %v345_v31 = vpop.f32.mrb[13].mxu0  ;;  %814 = vmatmul.mubr.f32.gmra.mrb[2].mxu1 %v389_v26  ;;  %v391_v34 = vmax.f32 %v341_v22, %v375_v27 }
 0x107   : > { %v390_v32 = vmax.f32 %v336_v25, %v374_v28  ;;  %v346_v33 = vadd.f32 %v1153_v46, %v345_v31 }
 0x108   : > { %v377_v35 = vmul.f32 0.01, %v351_v30 }
 0x109   : > { %v376_v36 = vmul.f32 0.01, %v346_v33  ;;  %v768_v37 = vpop.f32.mrb[14].mxu0  ;;  %816 = vmatprep.mubr.f32.mxu1 %v390_v32 }
 0x10a   : > { %v361_v38 = vadd.f32 %v768_v37, %v1153_v46  ;;  %v355_v39 = vpop.f32.mrb[15].mxu0  ;;  %817 = vmatmul.mubr.f32.gmra.mrb[4].mxu1 %v391_v34  ;;  %v393_v42 = vmax.f32 %v351_v30, %v377_v35 }
 0x10b   : > { %v392_v40 = vmax.f32 %v346_v33, %v376_v36  ;;  %v356_v41 = vadd.f32 %v1153_v46, %v355_v39 }
 0x10c   : > { %v379_v43 = vmul.f32 0.01, %v361_v38 }
 0x10d   : > { %v378_v44 = vmul.f32 0.01, %v356_v41  ;;  %819 = vmatprep.mubr.f32.mxu1 %v392_v40 }
 0x10e   : > { %820 = vmatmul.mubr.f32.gmra.mrb[6].mxu1 %v393_v42  ;;  %v395_v47 = vmax.f32 %v361_v38, %v379_v43 }
 0x10f   : > { %v394_v45 = vmax.f32 %v356_v41, %v378_v44 }
 0x111   : > { %822 = vmatprep.mubr.f32.mxu1 %v394_v45 }
 0x112   : > { %823 = vmatmul.mubr.f32.gmra.mrb[8].mxu1 %v395_v47 }
 0x1c9   : > { %v803_v49 = vpop.f32.mrb[16].mxu0 }
 0x1ca   : > { %v489_v50 = vadd.f32 %v803_v49, %v678_v48  ;;  %v483_v51 = vpop.f32.mrb[17].mxu0 }
 0x1cb   : > { %v484_v46 = vadd.f32 %v678_v48, %v483_v51 }
 0x1cc   : > { %563 = vst [vmem:[%s1177_s6 + $0x8] sm:$0xff] %v489_v50 }
 0x1cd   : > { %562 = vst [vmem:[%s1177_s6] sm:$0xff] %v484_v46  ;;  %v806_v52 = vpop.f32.mrb[18].mxu0 }
 0x1ce   : > { %v499_v53 = vadd.f32 %v806_v52, %v678_v48  ;;  %v493_v54 = vpop.f32.mrb[19].mxu0 }
 0x1cf   : > { %v494_v55 = vadd.f32 %v678_v48, %v493_v54 }
 0x1d0   : > { %565 = vst [vmem:[%s1177_s6 + $0x18] sm:$0xff] %v499_v53 }
 0x1d1   : > { %564 = vst [vmem:[%s1177_s6 + $0x10] sm:$0xff] %v494_v55  ;;  %v809_v56 = vpop.f32.mrb[20].mxu0 }
 0x1d2   : > { %v509_v57 = vadd.f32 %v809_v56, %v678_v48  ;;  %v503_v58 = vpop.f32.mrb[21].mxu0 }
 0x1d3   : > { %v504_v59 = vadd.f32 %v678_v48, %v503_v58 }
 0x1d4   : > { %567 = vst [vmem:[%s1177_s6 + $0x28] sm:$0xff] %v509_v57 }
 0x1d5   : > { %566 = vst [vmem:[%s1177_s6 + $0x20] sm:$0xff] %v504_v59  ;;  %v812_v60 = vpop.f32.mrb[0].mxu1 }
 0x1d6   : > { %v519_v61 = vadd.f32 %v812_v60, %v678_v48  ;;  %v513_v62 = vpop.f32.mrb[1].mxu1 }
 0x1d7   : > { %v514_v63 = vadd.f32 %v678_v48, %v513_v62 }
 0x1d8   : > { %569 = vst [vmem:[%s1177_s6 + $0x38] sm:$0xff] %v519_v61 }
 0x1d9   : > { %568 = vst [vmem:[%s1177_s6 + $0x30] sm:$0xff] %v514_v63  ;;  %v815_v0 = vpop.f32.mrb[2].mxu1 }
 0x1da   : > { %v529_v1 = vadd.f32 %v815_v0, %v678_v48  ;;  %v523_v2 = vpop.f32.mrb[3].mxu1 }
 0x1db   : > { %v524_v3 = vadd.f32 %v678_v48, %v523_v2 }
 0x1dc   : > { %571 = vst [vmem:[%s1177_s6 + $0x48] sm:$0xff] %v529_v1 }
 0x1dd   : > { %570 = vst [vmem:[%s1177_s6 + $0x40] sm:$0xff] %v524_v3  ;;  %v818_v4 = vpop.f32.mrb[4].mxu1 }
 0x1de   : > { %v539_v5 = vadd.f32 %v818_v4, %v678_v48  ;;  %v533_v6 = vpop.f32.mrb[5].mxu1 }
 0x1df   : > { %v534_v7 = vadd.f32 %v678_v48, %v533_v6 }
 0x1e0   : > { %573 = vst [vmem:[%s1177_s6 + $0x58] sm:$0xff] %v539_v5 }
 0x1e1   : > { %572 = vst [vmem:[%s1177_s6 + $0x50] sm:$0xff] %v534_v7  ;;  %v821_v8 = vpop.f32.mrb[6].mxu1 }
 0x1e2   : > { %v549_v9 = vadd.f32 %v821_v8, %v678_v48  ;;  %v543_v10 = vpop.f32.mrb[7].mxu1 }
 0x1e3   : > { %v544_v11 = vadd.f32 %v678_v48, %v543_v10 }
 0x1e4   : > { %575 = vst [vmem:[%s1177_s6 + $0x68] sm:$0xff] %v549_v9 }
 0x1e5   : > { %574 = vst [vmem:[%s1177_s6 + $0x60] sm:$0xff] %v544_v11  ;;  %v824_v12 = vpop.f32.mrb[8].mxu1 }
 0x1e6   : > { %v559_v13 = vadd.f32 %v824_v12, %v678_v48  ;;  %v553_v14 = vpop.f32.mrb[9].mxu1 }
 0x1e7   : > { %v554_v15 = vadd.f32 %v678_v48, %v553_v14 }
 0x1e8   : > { %577 = vst [vmem:[%s1177_s6 + $0x78] sm:$0xff] %v559_v13 }
 0x1e9   : > { %576 = vst [vmem:[%s1177_s6 + $0x70] sm:$0xff] %v554_v15 }
 0x1ea   : > { %935 = shalt.err (!%p932_p3)
}
 0x1eb   : > { %s936_s25 = scalar_lea.hbm %s1198_s17, 2048  ;;  %s940_s28 = scalar_lea.hbm %s1249_s2, 4096 }
 0x1ec   : > { %p937_p4 = scmp.ne.s32.totalorder %s1198_s17, %s936_s25  ;;  %p941_p9 = scmp.lt.u32.totalorder %s1198_s17, %s1249_s2 }
 0x1ed   : > { %p942_p10 = scmp.lt.u32.totalorder %s940_s28, %s936_s25  ;;  %p944_p12 = scmp.lt.u32.totalorder %s936_s25, %s1198_s17 }
 0x1ee   : > { %p938_p7 = pnand %p937_p4, %p1042_p5 }
 0x1ef   : > { %p943_p11 = por %p942_p10, %p941_p9 }
 0x1f0   : > { %p939_p8 = pneg %p938_p7 }
 0x1f1   : > { %p945_p13 = por %p944_p12, %p943_p11 }
 0x1f3   : > { %p946_p0 = pnand %p945_p13, %p939_p8 }
 0x1f5   : > { %949 = shalt.err (!%p946_p0)
}
 0x1f6   : > { %s987_s3 = smov 128   ;;  %s988_s4 = smov 8  }
 0x1f7   : > { %881 = dma.vmem_to_hbm [thread:$0]  (%p1042_p5), %s1200_s8, 2048, %s1198_s17, %s1206_s13, %s987_s3, %s987_s3, %s988_s4  }
 0x1f8 PF: > { %p887_p1 = scmp.ge.s32.totalorder %s984_s12, 2  ;;  %s607_s5 = sand.u32 1, %s972_s9  }
 0x1f9   : > { %s608_s6 = scalar_lea.sflag [#allocation3], %s607_s5 }
 0x1fa   : > { %p884_p2 = pnand %p887_p1, %p1046_p6 }
 0x1fc   : > { %967 = dma.done.wait (!%p884_p2), %s608_s6, 2048  }
 0x1fd   : > { %969 = vsyncadd (!%p884_p2), %s608_s6, 4294965248  ;;  %p12_p3 = scmp.ge.s32.totalorder %s1029_s15, 4   ;;  %s1252_s9 = smov %s976_s10 }
 0x1fe   : > { %s1253_s10 = smov %s980_s11  ;;  %s1254_s11 = smov %s1040_s18 }
 0x1ff   : > { %s1255_s12 = smov %s1029_s15  ;;  %14 = sbr.rel (!%p12_p3) target bundleno = 3 (0x3), region = 63 }
 0x206   :  { %613 = vsyncpa [#allocation3], 1 }
 0x207   :  { %615 = vsyncpa [#allocation3 + $0x1], 1 }

</bundles_post_ra>
